<compile_context>
chip_gen: v5e
topology: v5e:2x2
jax: 0.10.0
libtpu: 0.0.40
codegen_flags: <defaults>
</compile_context>

<pallas_src>
import functools
import math

import jax
import jax.numpy as jnp
from jax.experimental import pallas as pl
from jax.experimental.pallas import tpu as pltpu

_EPS = 1e-8                               # torch.nn.CosineSimilarity default eps
_TILE_B_CAP = 1024                        # rows/tile; amortizes ~0.35us per-step overhead
_VMEM_PIPELINE_BUDGET = 8 * 1024 * 1024   # bytes for 2 inputs x 2 pipeline buffers


def _cosine_loss_kernel(x_ref, y_ref, o_ref, *, rows_total, tile_b):
    """One batch tile: per-row cosine similarity, summed into a partial sum."""
    x = x_ref[...].astype(jnp.float32)             # (TB, S)
    y = y_ref[...].astype(jnp.float32)             # (TB, S)

    dot = jnp.sum(x * y, axis=-1, keepdims=True)   # (TB, 1)  XLU lane-reduce
    nx2 = jnp.sum(x * x, axis=-1, keepdims=True)
    ny2 = jnp.sum(y * y, axis=-1, keepdims=True)

    # torch: w12 * rsqrt(clamp_min(w1 * w2, eps^2))
    sim = dot * jax.lax.rsqrt(jnp.maximum(nx2 * ny2, _EPS * _EPS))   # (TB, 1)

    if rows_total % tile_b != 0:
        # Mask rows of the partial boundary tile that lie past the real batch.
        row = (pl.program_id(0) * tile_b
               + jax.lax.broadcasted_iota(jnp.int32, sim.shape, 0))
        sim = jnp.where(row < rows_total, sim, 0.0)

    partial = jnp.sum(sim)                          # scalar partial sum of sims
    # Lane-dense (1, 8, 128) block per grid step -> unmasked stores, and the
    # grid axis stays "parallel" (no shared accumulator across steps).
    o_ref[...] = jnp.full(o_ref.shape, partial, dtype=o_ref.dtype)


def _resolve_tile_b(b: int, s: int, itemsize: int, tile_b) -> int:
    if tile_b is None:
        per_row = 2 * 2 * s * itemsize              # 2 inputs x 2 pipeline buffers
        tile_b = _VMEM_PIPELINE_BUDGET // max(per_row, 1)
        tile_b = min(tile_b, _TILE_B_CAP)
    tile_b = max(8, (int(tile_b) // 8) * 8)          # sublane-aligned
    if b <= tile_b:
        return b                                     # single full-batch tile
    return tile_b


@functools.partial(jax.jit, static_argnames=("tile_b",))
def cosine_similarity_loss(original: jax.Array, reconstructed: jax.Array,
                           *, tile_b=None) -> jax.Array:
    """Pallas impl of CosineSimilarityLoss.forward((original, reconstructed))."""
    # tensor[..., -1]; the strided slice is fused into the pallas operands
    # via allow_input_fusion (no materialized HBM intermediate under jit).
    x = original[..., -1]
    y = reconstructed[..., -1]

    # Cosine similarity over the (new) last axis; flatten any leading axes.
    lead_shape = x.shape[:-1]
    b = int(math.prod(lead_shape)) if lead_shape else 1
    s = x.shape[-1]
    x2 = x.reshape(b, s)
    y2 = y.reshape(b, s)

    tb = _resolve_tile_b(b, s, jnp.dtype(x2.dtype).itemsize, tile_b)
    num_tiles = pl.cdiv(b, tb)

    # TODO(synk): for very long S a second "arbitrary" grid axis over S-chunks
    # (accumulating dot/|x|^2/|y|^2 partials in VMEM scratch) would be needed.

    kernel = functools.partial(_cosine_loss_kernel, rows_total=b, tile_b=tb)
    partials = pl.pallas_call(
        kernel,
        out_shape=jax.ShapeDtypeStruct((num_tiles, 8, 128), jnp.float32),
        grid=(num_tiles,),
        in_specs=[
            pl.BlockSpec((tb, s), lambda i: (i, 0)),
            pl.BlockSpec((tb, s), lambda i: (i, 0)),
        ],
        out_specs=pl.BlockSpec((1, 8, 128), lambda i: (i, 0, 0)),
        compiler_params=pltpu.CompilerParams(
            dimension_semantics=("parallel",),
            allow_input_fusion=(True, True),
        ),
    )(x2, y2)

    # Tiny finalize in JAX: mean over the real rows, negate.
    total = jnp.sum(partials[:, 0, 0])
    return -(total / jnp.float32(b))


def _reference(original, reconstructed):
    x = original[..., -1].astype(jnp.float32)
    y = reconstructed[..., -1].astype(jnp.float32)
    dot = jnp.sum(x * y, axis=-1)
    nx2 = jnp.sum(x * x, axis=-1)
    ny2 = jnp.sum(y * y, axis=-1)
    sim = dot * jax.lax.rsqrt(jnp.maximum(nx2 * ny2, _EPS * _EPS))
    return -jnp.mean(sim)


if __name__ == "__main__":
    key = jax.random.PRNGKey(0)
    k1, k2, k3, k4 = jax.random.split(key, 4)

    # Case 1: shapes implied by the module -- (batch=2, seq=8, hidden=32);
    # [..., -1] -> (2, 8); cosine over the 8-long axis; mean over batch.
    B, S, H = 2, 8, 32
    original = jax.random.normal(k1, (B, S, H), dtype=jnp.float32)
    reconstructed = jax.random.normal(k2, (B, S, H), dtype=jnp.float32)
    loss = cosine_similarity_loss(original, reconstructed)
    jax.block_until_ready(loss)
    ref = _reference(original, reconstructed)
    assert jnp.allclose(loss, ref, atol=1e-5, rtol=1e-5), (loss, ref)

    # Case 2: forces a multi-tile grid with a partial boundary tile
    # (b=50 not a multiple of tile_b=16) to exercise masking + parallel grid.
    B2, S2, H2 = 50, 256, 4
    o2 = jax.random.normal(k3, (B2, S2, H2), dtype=jnp.float32)
    r2 = jax.random.normal(k4, (B2, S2, H2), dtype=jnp.float32)
    loss2 = cosine_similarity_loss(o2, r2, tile_b=16)
    jax.block_until_ready(loss2)
    ref2 = _reference(o2, r2)
    assert jnp.allclose(loss2, ref2, atol=1e-5, rtol=1e-5), (loss2, ref2)

    print("KERNEL_OK")
</pallas_src>

<mosaic_0001>
module attributes {stable_mosaic.version = 11 : i64} {
  func.func @_cosine_loss_kernel(%arg0: i32, %arg1: memref<2x8xf32, #tpu.memory_space<vmem>>, %arg2: memref<2x8xf32, #tpu.memory_space<vmem>>, %arg3: memref<1x8x128xf32, #tpu.memory_space<vmem>>) attributes {dimension_semantics = [#tpu.dimension_semantics<parallel>], iteration_bounds = array<i64: 1>, scalar_prefetch = 0 : i64, scratch_operands = 0 : i64, tpu.core_type = #tpu.core_type<tc>, window_params = [{transform_indices = @transform_0, window_bounds = array<i64: 2, 8>}, {transform_indices = @transform_1, window_bounds = array<i64: 2, 8>}, {transform_indices = @transform_2, window_bounds = array<i64: 1, 8, 128>}]} {
    %c0 = arith.constant 0 : index
    %c0_0 = arith.constant 0 : index
    %0 = vector.load %arg1[%c0, %c0_0] : memref<2x8xf32, #tpu.memory_space<vmem>>, vector<2x8xf32>
    %c0_1 = arith.constant 0 : index
    %c0_2 = arith.constant 0 : index
    %1 = vector.load %arg2[%c0_1, %c0_2] : memref<2x8xf32, #tpu.memory_space<vmem>>, vector<2x8xf32>
    %2 = arith.mulf %0, %1 : vector<2x8xf32>
    %cst = arith.constant dense<0.000000e+00> : vector<2xf32>
    %3 = vector.multi_reduction <add>, %2, %cst [1] : vector<2x8xf32> to vector<2xf32>
    %4 = vector.shape_cast %3 : vector<2xf32> to vector<2x1xf32>
    %5 = arith.mulf %0, %0 : vector<2x8xf32>
    %cst_3 = arith.constant dense<0.000000e+00> : vector<2xf32>
    %6 = vector.multi_reduction <add>, %5, %cst_3 [1] : vector<2x8xf32> to vector<2xf32>
    %7 = vector.shape_cast %6 : vector<2xf32> to vector<2x1xf32>
    %8 = arith.mulf %1, %1 : vector<2x8xf32>
    %cst_4 = arith.constant dense<0.000000e+00> : vector<2xf32>
    %9 = vector.multi_reduction <add>, %8, %cst_4 [1] : vector<2x8xf32> to vector<2xf32>
    %10 = vector.shape_cast %9 : vector<2xf32> to vector<2x1xf32>
    %11 = arith.mulf %7, %10 : vector<2x1xf32>
    %cst_5 = arith.constant 1.000000e-16 : f32
    %12 = vector.broadcast %cst_5 : f32 to vector<2x1xf32>
    %13 = arith.maximumf %11, %12 : vector<2x1xf32>
    %14 = math.rsqrt %13 : vector<2x1xf32>
    %15 = arith.mulf %4, %14 : vector<2x1xf32>
    %16 = vector.shape_cast %15 : vector<2x1xf32> to vector<1x2x1xf32>
    %cst_6 = arith.constant dense<0.000000e+00> : vector<1xf32>
    %17 = vector.multi_reduction <add>, %16, %cst_6 [1, 2] : vector<1x2x1xf32> to vector<1xf32>
    %18 = vector.shape_cast %17 : vector<1xf32> to vector<1x1x1xf32>
    %19 = vector.extract %18[0, 0, 0] : f32 from vector<1x1x1xf32>
    %20 = vector.broadcast %19 : f32 to vector<1x8x128xf32>
    %c0_7 = arith.constant 0 : index
    %c0_8 = arith.constant 0 : index
    %c0_9 = arith.constant 0 : index
    %21 = vector.load %arg3[%c0_7, %c0_8, %c0_9] : memref<1x8x128xf32, #tpu.memory_space<vmem>>, vector<1x8x128xf32>
    tpu.vector_store %arg3[%c0_7, %c0_8, %c0_9], %20 {strides = array<i32>} : memref<1x8x128xf32, #tpu.memory_space<vmem>>, vector<1x8x128xf32>,
    return
  }
  func.func @transform_0(%arg0: i32) -> (i32, i32) {
    %c0_i32 = arith.constant 0 : i32
    %c0_i32_0 = arith.constant 0 : i32
    return %arg0, %c0_i32 : i32, i32
  }
  func.func @transform_1(%arg0: i32) -> (i32, i32) {
    %c0_i32 = arith.constant 0 : i32
    %c0_i32_0 = arith.constant 0 : i32
    return %arg0, %c0_i32 : i32, i32
  }
  func.func @transform_2(%arg0: i32) -> (i32, i32, i32) {
    %c0_i32 = arith.constant 0 : i32
    %c0_i32_0 = arith.constant 0 : i32
    %c0_i32_1 = arith.constant 0 : i32
    return %arg0, %c0_i32, %c0_i32_0 : i32, i32, i32
  }
}

</mosaic_0001>

<bundles_post_ra>
// kernel: cosine_similarity_loss.1
= control target key start
LH: loop header
LB: loop body
LE: loop exit
PB: predicated region body
PF: predicated region fallthrough
CT: control target
= control target key end

     0   :  { %vm14_vm0 = vcmask 58368   ;;  %vm39_vm4 = vcmask 1024   ;;  %s84_s0 = inlined_call_operand.vmem [shape: f32[2,8], index: 0, kind: input, shape index: {}]   ;;  %s85_s1 = inlined_call_operand.vmem [shape: f32[2,8], index: 1, kind: input, shape index: {}]   ;;  %s86_s2 = inlined_call_operand.vmem [shape: f32[1,8,128], index: 2, kind: output, shape index: {}]  }
   0x1   :  { %v11_v0 = vld [vmem:[%s84_s0] sm:$0x3] }
   0x2   :  { %v12_v1 = vld [vmem:[%s85_s1] sm:$0x3]  ;;  %v18_v2 = vmul.f32 %v11_v0, %v11_v0 }
   0x3   :  { %v13_v3 = vmul.f32 %v12_v1, %v11_v0  ;;  %v22_v6 = vmul.f32 %v12_v1, %v12_v1 }
   0x4   :  { %v19_v4 = vsel %vm14_vm0, %v18_v2, 0.0 }
   0x5   :  { %v15_v5 = vsel %vm14_vm0, %v13_v3, 0.0  ;;  %20 = vadd.xlane.f32.xlu0 %v19_v4  ;;  %v23_v7 = vsel %vm14_vm0, %v22_v6, 0.0 }
   0x6   :  { %16 = vadd.xlane.f32.xlu1 %v15_v5 }
   0xd   :  { %24 = vadd.xlane.f32.xlu0 %v23_v7 }
  0x78   :  { %v21_v8 = vpop.xlane.xlu0 %20 }
  0x79   :  { %v17_v18 = vpop.xlane.xlu1 %16 }
  0x80   :  { %v25_v9 = vpop.xlane.xlu0 %24 }
  0x81   :  { %v26_v10 = vmul.f32 %v25_v9, %v21_v8 }
  0x83   :  { %v27_v11 = vmax.f32 %v26_v10, 1e-16 }
  0x85   :  { %58 = vrsqrt.f32 %v27_v11  ;;  %vm34_vm2 = vweird.f32 %v27_v11 }
  0x8b   :  { %v59_v12 = vpop.eup %58 }
  0x8c   :  { %v29_v13 = vmul.f32 %v59_v12, %v27_v11  ;;  %vm35_vm1 = vweird.f32 %v59_v12 }
  0x8d   :  { %vm36_vm3 = vmor %vm34_vm2, %vm35_vm1 }
  0x8e   :  { %v30_v14 = vmul.f32 %v59_v12, %v29_v13 }
  0x90   :  { %v31_v15 = vmul.f32 0.5, %v30_v14 }
  0x92   :  { %v32_v16 = vsub.f32 1.5, %v31_v15 }
  0x94   :  { %v33_v17 = vmul.f32 %v59_v12, %v32_v16 }
  0x96   :  { %v37_v19 = vsel %vm36_vm3, %v59_v12, %v33_v17 }
  0x97   :  { %v38_v20 = vmul.f32 %v37_v19, %v17_v18 }
  0x99   :  { %v40_v21 = vsel %vm39_vm4, %v38_v20, 0.0 }
  0x9a   :  { %41 = vadd.xlane.f32.xlu1 %v40_v21 }
 0x10d   :  { %v42_v22 = vpop.xlane.xlu1 %41 }
 0x10e   :  { %v43_v23 = vrot.slane %v42_v22, 4 }
 0x110   :  { %v44_v24 = vadd.f32 %v43_v23, %v42_v22 }
 0x112   :  { %v45_v25 = vrot.slane %v44_v24, 2 }
 0x114   :  { %v46_v26 = vadd.f32 %v45_v25, %v44_v24 }
 0x116   :  { %v47_v27 = vrot.slane %v46_v26, 1 }
 0x118   :  { %v48_v28 = vadd.f32 %v47_v27, %v46_v26 }
 0x11a   :  { %56 = vpush %v48_v28 }
 0x14b   :  { %s57_s0 = spop %56 }
 0x14c   :  { %v50_v29 = vstv %s57_s0 }
 0x14d   :  { %51 = vst [vmem:[%s86_s2] sm:$0xff] %v50_v29 }

</bundles_post_ra>
